<compile_context>
chip_gen: v5e
topology: v5e:2x2
jax: 0.10.0
libtpu: 0.0.40
codegen_flags: <defaults>
</compile_context>

<pallas_src>
import math

import jax
import jax.numpy as jnp
from jax.experimental import pallas as pl
from jax.experimental.pallas import tpu as pltpu

_LANE = 128


def _round_up(n, m):
    return ((n + m - 1) // m) * m


def _conv1d_subsampling1_kernel(x_ref, w1_ref, w2_ref, w3_ref, b_ref, pe_ref, o_ref):
    """One batch tile per grid step: conv1+ReLU, conv2+ReLU, linear(+xscale), +PE.

    Each layer is a single MXU matmul over the whole batch tile (batch folded into M).
    """
    bt, T, Ci = x_ref.shape
    Cm = o_ref.shape[-1]
    T1 = T - 2        # after conv1
    Tout = T - 4      # after conv2

    w1 = w1_ref[...]                       # (3*Ci, Cm) bf16, im2col layout (tap-major rows)
    w2 = w2_ref[...]                       # (3*Cm, Cm) bf16
    w3 = w3_ref[...]                       # (Cm, Cm)  bf16, xscale pre-folded
    b = b_ref[...]                         # (3, Cm)  f32: rows = conv1, conv2, linear bias
    b1, b2, b3 = b[0:1], b[1:2], b[2:3]    # each (1, Cm), broadcast over M
    pe = pe_ref[...]                       # (Tout, Cm) f32

    x = x_ref[...]                         # (bt, T, Ci) bf16

    # conv1 (k=3, stride=1, valid) via im2col -> single MXU matmul, M = bt*(T-2).
    x_im = jnp.concatenate([x[:, 0:T - 2], x[:, 1:T - 1], x[:, 2:T]], axis=-1)
    x_im = x_im.reshape(bt * T1, 3 * Ci)
    h1 = jnp.dot(x_im, w1, preferred_element_type=jnp.float32)
    h1 = jnp.maximum(h1 + b1, 0.0).astype(jnp.bfloat16)          # (bt*T1, Cm)
    h1 = h1.reshape(bt, T1, Cm)

    # conv2 (k=3, stride=1, valid) via im2col, M = bt*(T-4).
    h_im = jnp.concatenate([h1[:, 0:T1 - 2], h1[:, 1:T1 - 1], h1[:, 2:T1]], axis=-1)
    h_im = h_im.reshape(bt * Tout, 3 * Cm)
    h2 = jnp.dot(h_im, w2, preferred_element_type=jnp.float32)
    h2 = jnp.maximum(h2 + b2, 0.0).astype(jnp.bfloat16)          # (bt*Tout, Cm)

    # Linear (xscale folded into w3/b3) + positional encoding (dropout is identity in eval).
    y = jnp.dot(h2, w3, preferred_element_type=jnp.float32) + b3
    y = y.reshape(bt, Tout, Cm) + pe[None]
    o_ref[...] = y.astype(o_ref.dtype)


def _positional_encoding(length, d_model):
    """Matches PositionalEncoding.extend_pe (reverse=False). Returns (length, d_model) f32."""
    pos = jnp.arange(length, dtype=jnp.float32)[:, None]
    div = jnp.exp(jnp.arange(0, d_model, 2, dtype=jnp.float32)
                  * -(math.log(10000.0) / d_model))
    pe = jnp.zeros((length, d_model), jnp.float32)
    pe = pe.at[:, 0::2].set(jnp.sin(pos * div))
    pe = pe.at[:, 1::2].set(jnp.cos(pos * div))
    return pe


def _prepare_params(params, idim, odim, Ci, Cm, tout):
    """Pad to lane-dense widths, flatten conv taps to im2col layout, fold xscale, cast to bf16."""
    xscale = math.sqrt(float(odim))
    w1 = jnp.pad(params["w1"], ((0, 0), (0, Ci - idim), (0, Cm - odim)))
    w2 = jnp.pad(params["w2"], ((0, 0), (0, Cm - odim), (0, Cm - odim)))
    w3 = jnp.pad(params["w3"] * xscale, ((0, Cm - odim), (0, Cm - odim)))
    b1 = jnp.pad(params["b1"], (0, Cm - odim))
    b2 = jnp.pad(params["b2"], (0, Cm - odim))
    b3 = jnp.pad(params["b3"] * xscale, (0, Cm - odim))
    pe = jnp.pad(_positional_encoding(tout, odim), ((0, 0), (0, Cm - odim)))
    return dict(
        w1=w1.reshape(3 * Ci, Cm).astype(jnp.bfloat16),   # row index = tap*Ci + c_in
        w2=w2.reshape(3 * Cm, Cm).astype(jnp.bfloat16),
        w3=w3.astype(jnp.bfloat16),
        b=jnp.stack([b1, b2, b3]).astype(jnp.float32),    # (3, Cm) merged bias input
        pe=pe.astype(jnp.float32),                        # f32: added in f32, free accuracy
    )


def _vmem_cap_bytes():
    """Generation-aware scoped-VMEM cap (~half physical: 32 MiB on v7x, 48 MiB on v5e/v6e)."""
    try:
        phys = int(pltpu.get_tpu_info().vmem_capacity_bytes)
    except Exception:
        phys = 128 * 1024 * 1024
    return min(48 * 1024 * 1024, phys // 2)


def _vmem_estimate(bt, T, Tout, Ci, Cm):
    """Per-step VMEM footprint incl. double-buffered pipeline blocks and im2col temporaries."""
    x_blk = bt * T * Ci * 2                       # x tile (bf16)
    out_blk = bt * Tout * Cm * 2                  # out tile (bf16)
    weights = (3 * Ci + 3 * Cm + Cm) * Cm * 2     # bf16 weights
    biases = 8 * Cm * 4                           # (3, Cm) f32, sublane-padded to 8
    pe = _round_up(Tout, 8) * Cm * 4              # f32 PE table
    tmp = (bt * (T - 2) * 3 * Ci * 2              # x_im (bf16)
           + bt * (T - 2) * Cm * (4 + 2)          # h1 f32 + bf16 copy
           + bt * Tout * 3 * Cm * 2               # h_im (bf16)
           + bt * Tout * Cm * (4 + 2)             # h2 f32 + bf16 copy
           + bt * Tout * Cm * 4 * 2)              # y f32 (+ PE add)
    return 2 * (x_blk + out_blk + weights + biases + pe) + tmp


def conv1d_subsampling1(x, x_mask, params, *, batch_block=None):
    """x: (B, T, idim) f32, x_mask: (B, 1, T) or None.
    Returns ((B, T-4, odim) f32, mask[:, :, :T-4])."""
    B, T, idim = x.shape
    if T < 5:
        raise ValueError("Conv1dSubsampling1 requires T >= 5 (two valid k=3 convolutions).")
    odim = params["w1"].shape[2]
    Tout = T - 4
    Ci = _round_up(idim, _LANE)
    Cm = _round_up(odim, _LANE)

    prep = _prepare_params(params, idim, odim, Ci, Cm, Tout)

    # Batch elements per grid step: target M ~= 512 rows per matmul (MXU-filling), but keep
    # >= 2 grid steps whenever B >= 2 so the "parallel" batch axis feeds both v7x TensorCores.
    if batch_block is None:
        batch_block = max(1, 512 // max(Tout, 1))
        if B >= 2:
            batch_block = min(batch_block, max(1, B // 2))
        batch_block = min(batch_block, B)
    Bp = _round_up(B, batch_block)

    # Single fused pad + bf16 cast pass over x (one XLA op; no separate pre-passes).
    xb = jnp.pad(x, ((0, Bp - B), (0, 0), (0, Ci - idim))).astype(jnp.bfloat16)

    est = _vmem_estimate(batch_block, T, Tout, Ci, Cm)
    vmem_limit = int(min(max(2 * est, 16 * 1024 * 1024), _vmem_cap_bytes()))

    out_p = pl.pallas_call(
        _conv1d_subsampling1_kernel,
        out_shape=jax.ShapeDtypeStruct((Bp, Tout, Cm), jnp.bfloat16),
        grid=(Bp // batch_block,),
        in_specs=[
            pl.BlockSpec((batch_block, T, Ci), lambda g: (g, 0, 0)),   # x (per-batch-tile)
            pl.BlockSpec((3 * Ci, Cm), lambda g: (0, 0)),              # conv1 weight (im2col)
            pl.BlockSpec((3 * Cm, Cm), lambda g: (0, 0)),              # conv2 weight (im2col)
            pl.BlockSpec((Cm, Cm), lambda g: (0, 0)),                  # linear weight (xscale folded)
            pl.BlockSpec((3, Cm), lambda g: (0, 0)),                   # merged biases (f32)
            pl.BlockSpec((Tout, Cm), lambda g: (0, 0)),                # positional encoding (f32)
        ],
        out_specs=pl.BlockSpec((batch_block, Tout, Cm), lambda g: (g, 0, 0)),
        compiler_params=pltpu.CompilerParams(
            dimension_semantics=("parallel",),
            vmem_limit_bytes=vmem_limit),
    )(xb, prep["w1"], prep["w2"], prep["w3"], prep["b"], prep["pe"])

    # Drop batch/lane padding and upcast to f32 in the same wrapper pass.
    out = out_p[:B, :, :odim].astype(jnp.float32)
    if x_mask is None:
        return out, None
    return out, x_mask[:, :, :-2][:, :, :-2]       # == x_mask[:, :, :T-4]


def _reference(x, params):
    """Pure-JAX f32 reference mirroring the PyTorch forward (eval mode)."""
    odim = params["w1"].shape[2]

    def conv_relu(h, w, b):
        T = h.shape[1]
        acc = sum(jnp.einsum("btc,cd->btd", h[:, k:k + T - 2], w[k]) for k in range(3)) + b
        return jnp.maximum(acc, 0.0)

    h1 = conv_relu(x, params["w1"], params["b1"])
    h2 = conv_relu(h1, params["w2"], params["b2"])
    y = h2 @ params["w3"] + params["b3"]
    pe = _positional_encoding(y.shape[1], odim)[None]
    return y * math.sqrt(float(odim)) + pe


if __name__ == "__main__":
    B, T, idim, odim = 2, 16, 8, 32

    key = jax.random.PRNGKey(0)
    kx, k1, k2, k3, k4, k5, k6 = jax.random.split(key, 7)

    x = jax.random.normal(kx, (B, T, idim), jnp.float32)
    x_mask = jnp.ones((B, 1, T), dtype=bool)

    # Synthetic parameters.  PyTorch shapes -> stored layout:
    #   Conv1d weight (odim, idim, 3)  -> (3, idim, odim)  (tap, c_in, c_out)
    #   Linear weight (odim, odim), y = x @ W.T + b -> stored as W.T (in, out)
    params = {
        "w1": jax.random.normal(k1, (3, idim, odim), jnp.float32) * 0.1,
        "b1": jax.random.normal(k2, (odim,), jnp.float32) * 0.1,
        "w2": jax.random.normal(k3, (3, odim, odim), jnp.float32) * 0.1,
        "b2": jax.random.normal(k4, (odim,), jnp.float32) * 0.1,
        "w3": jax.random.normal(k5, (odim, odim), jnp.float32) * 0.1,
        "b3": jax.random.normal(k6, (odim,), jnp.float32) * 0.1,
    }

    out, mask_out = conv1d_subsampling1(x, x_mask, params)
    out = jax.block_until_ready(out)

    ref = _reference(x, params)
    assert out.shape == (B, T - 4, odim)
    assert mask_out.shape == (B, 1, T - 4)
    # bf16 MXU inputs + bf16 output store => relaxed tolerance vs the pure-f32 reference.
    assert jnp.allclose(out, ref, atol=5e-2, rtol=5e-2), float(jnp.max(jnp.abs(out - ref)))

    # TODO(synk): dropout layers are identity here (eval mode); training-mode dropout not implemented.
    print("KERNEL_OK")
</pallas_src>

<mosaic_0001>
module attributes {stable_mosaic.version = 11 : i64} {
  func.func @_conv1d_subsampling1_kernel(%arg0: i32, %arg1: memref<1x16x128xbf16, #tpu.memory_space<vmem>>, %arg2: memref<384x128xbf16, #tpu.memory_space<vmem>>, %arg3: memref<384x128xbf16, #tpu.memory_space<vmem>>, %arg4: memref<128x128xbf16, #tpu.memory_space<vmem>>, %arg5: memref<3x128xf32, #tpu.memory_space<vmem>>, %arg6: memref<12x128xf32, #tpu.memory_space<vmem>>, %arg7: memref<1x12x128xbf16, #tpu.memory_space<vmem>>) attributes {dimension_semantics = [#tpu.dimension_semantics<parallel>], iteration_bounds = array<i64: 2>, scalar_prefetch = 0 : i64, scratch_operands = 0 : i64, tpu.core_type = #tpu.core_type<tc>, window_params = [{transform_indices = @transform_0, window_bounds = array<i64: 1, 16, 128>}, {pipeline_mode = #tpu.pipeline_mode<synchronous>, transform_indices = @transform_1, window_bounds = array<i64: 384, 128>}, {pipeline_mode = #tpu.pipeline_mode<synchronous>, transform_indices = @transform_2, window_bounds = array<i64: 384, 128>}, {pipeline_mode = #tpu.pipeline_mode<synchronous>, transform_indices = @transform_3, window_bounds = array<i64: 128, 128>}, {pipeline_mode = #tpu.pipeline_mode<synchronous>, transform_indices = @transform_4, window_bounds = array<i64: 3, 128>}, {pipeline_mode = #tpu.pipeline_mode<synchronous>, transform_indices = @transform_5, window_bounds = array<i64: 12, 128>}, {transform_indices = @transform_6, window_bounds = array<i64: 1, 12, 128>}]} {
    %c0 = arith.constant 0 : index
    %c0_0 = arith.constant 0 : index
    %0 = vector.load %arg2[%c0, %c0_0] : memref<384x128xbf16, #tpu.memory_space<vmem>>, vector<384x128xbf16>
    %c0_1 = arith.constant 0 : index
    %c0_2 = arith.constant 0 : index
    %1 = vector.load %arg3[%c0_1, %c0_2] : memref<384x128xbf16, #tpu.memory_space<vmem>>, vector<384x128xbf16>
    %c0_3 = arith.constant 0 : index
    %c0_4 = arith.constant 0 : index
    %2 = vector.load %arg4[%c0_3, %c0_4] : memref<128x128xbf16, #tpu.memory_space<vmem>>, vector<128x128xbf16>
    %c0_5 = arith.constant 0 : index
    %c0_6 = arith.constant 0 : index
    %3 = vector.load %arg5[%c0_5, %c0_6] : memref<3x128xf32, #tpu.memory_space<vmem>>, vector<3x128xf32>
    %4 = vector.extract_strided_slice %3 {offsets = [0, 0], sizes = [1, 128], strides = [1, 1]} : vector<3x128xf32> to vector<1x128xf32>
    %5 = vector.extract_strided_slice %3 {offsets = [1, 0], sizes = [1, 128], strides = [1, 1]} : vector<3x128xf32> to vector<1x128xf32>
    %6 = vector.extract_strided_slice %3 {offsets = [2, 0], sizes = [1, 128], strides = [1, 1]} : vector<3x128xf32> to vector<1x128xf32>
    %c0_7 = arith.constant 0 : index
    %c0_8 = arith.constant 0 : index
    %7 = vector.load %arg6[%c0_7, %c0_8] : memref<12x128xf32, #tpu.memory_space<vmem>>, vector<12x128xf32>
    %c0_9 = arith.constant 0 : index
    %c0_10 = arith.constant 0 : index
    %c0_11 = arith.constant 0 : index
    %8 = vector.load %arg1[%c0_9, %c0_10, %c0_11] : memref<1x16x128xbf16, #tpu.memory_space<vmem>>, vector<1x16x128xbf16>
    %9 = vector.extract_strided_slice %8 {offsets = [0, 0, 0], sizes = [1, 14, 128], strides = [1, 1, 1]} : vector<1x16x128xbf16> to vector<1x14x128xbf16>
    %10 = vector.extract_strided_slice %8 {offsets = [0, 1, 0], sizes = [1, 14, 128], strides = [1, 1, 1]} : vector<1x16x128xbf16> to vector<1x14x128xbf16>
    %11 = vector.extract_strided_slice %8 {offsets = [0, 2, 0], sizes = [1, 14, 128], strides = [1, 1, 1]} : vector<1x16x128xbf16> to vector<1x14x128xbf16>
    %12 = tpu.concatenate %9, %10, %11 in 2 : vector<1x14x128xbf16>, vector<1x14x128xbf16>, vector<1x14x128xbf16> -> vector<1x14x384xbf16>
    %13 = vector.shape_cast %12 : vector<1x14x384xbf16> to vector<14x384xbf16>
    %cst = arith.constant dense<0.000000e+00> : vector<14x128xf32>
    %14 = tpu.matmul %13, %0, %cst {dimension_numbers = #tpu.dot_dimension_numbers<[1], [0], [0], [1], [0, 0, 1, 1], [], []>} : vector<14x384xbf16>, vector<384x128xbf16>, vector<14x128xf32> -> vector<14x128xf32>
    %15 = vector.broadcast %4 : vector<1x128xf32> to vector<14x128xf32>
    %16 = arith.addf %14, %15 : vector<14x128xf32>
    %cst_12 = arith.constant 0.000000e+00 : f32
    %17 = vector.broadcast %cst_12 : f32 to vector<14x128xf32>
    %18 = arith.maximumf %16, %17 : vector<14x128xf32>
    %19 = arith.truncf %18 : vector<14x128xf32> to vector<14x128xbf16>
    %20 = vector.shape_cast %19 : vector<14x128xbf16> to vector<1x14x128xbf16>
    %21 = vector.extract_strided_slice %20 {offsets = [0, 0, 0], sizes = [1, 12, 128], strides = [1, 1, 1]} : vector<1x14x128xbf16> to vector<1x12x128xbf16>
    %22 = vector.extract_strided_slice %20 {offsets = [0, 1, 0], sizes = [1, 12, 128], strides = [1, 1, 1]} : vector<1x14x128xbf16> to vector<1x12x128xbf16>
    %23 = vector.extract_strided_slice %20 {offsets = [0, 2, 0], sizes = [1, 12, 128], strides = [1, 1, 1]} : vector<1x14x128xbf16> to vector<1x12x128xbf16>
    %24 = tpu.concatenate %21, %22, %23 in 2 : vector<1x12x128xbf16>, vector<1x12x128xbf16>, vector<1x12x128xbf16> -> vector<1x12x384xbf16>
    %25 = vector.shape_cast %24 : vector<1x12x384xbf16> to vector<12x384xbf16>
    %cst_13 = arith.constant dense<0.000000e+00> : vector<12x128xf32>
    %26 = tpu.matmul %25, %1, %cst_13 {dimension_numbers = #tpu.dot_dimension_numbers<[1], [0], [0], [1], [0, 0, 1, 1], [], []>} : vector<12x384xbf16>, vector<384x128xbf16>, vector<12x128xf32> -> vector<12x128xf32>
    %27 = vector.broadcast %5 : vector<1x128xf32> to vector<12x128xf32>
    %28 = arith.addf %26, %27 : vector<12x128xf32>
    %cst_14 = arith.constant 0.000000e+00 : f32
    %29 = vector.broadcast %cst_14 : f32 to vector<12x128xf32>
    %30 = arith.maximumf %28, %29 : vector<12x128xf32>
    %31 = arith.truncf %30 : vector<12x128xf32> to vector<12x128xbf16>
    %cst_15 = arith.constant dense<0.000000e+00> : vector<12x128xf32>
    %32 = tpu.matmul %31, %2, %cst_15 {dimension_numbers = #tpu.dot_dimension_numbers<[1], [0], [0], [1], [0, 0, 1, 1], [], []>} : vector<12x128xbf16>, vector<128x128xbf16>, vector<12x128xf32> -> vector<12x128xf32>
    %33 = vector.broadcast %6 : vector<1x128xf32> to vector<12x128xf32>
    %34 = arith.addf %32, %33 : vector<12x128xf32>
    %35 = vector.shape_cast %34 : vector<12x128xf32> to vector<1x12x128xf32>
    %36 = vector.shape_cast %7 : vector<12x128xf32> to vector<1x12x128xf32>
    %37 = arith.addf %35, %36 : vector<1x12x128xf32>
    %38 = arith.truncf %37 : vector<1x12x128xf32> to vector<1x12x128xbf16>
    %c0_16 = arith.constant 0 : index
    %c0_17 = arith.constant 0 : index
    %c0_18 = arith.constant 0 : index
    %39 = vector.load %arg7[%c0_16, %c0_17, %c0_18] : memref<1x12x128xbf16, #tpu.memory_space<vmem>>, vector<1x12x128xbf16>
    tpu.vector_store %arg7[%c0_16, %c0_17, %c0_18], %38 {strides = array<i32>} : memref<1x12x128xbf16, #tpu.memory_space<vmem>>, vector<1x12x128xbf16>,
    return
  }
  func.func @transform_0(%arg0: i32) -> (i32, i32, i32) {
    %c0_i32 = arith.constant 0 : i32
    %c0_i32_0 = arith.constant 0 : i32
    %c0_i32_1 = arith.constant 0 : i32
    return %arg0, %c0_i32, %c0_i32_0 : i32, i32, i32
  }
  func.func @transform_1(%arg0: i32) -> (i32, i32) {
    %c0_i32 = arith.constant 0 : i32
    %c0_i32_0 = arith.constant 0 : i32
    %c0_i32_1 = arith.constant 0 : i32
    return %c0_i32, %c0_i32_0 : i32, i32
  }
  func.func @transform_2(%arg0: i32) -> (i32, i32) {
    %c0_i32 = arith.constant 0 : i32
    %c0_i32_0 = arith.constant 0 : i32
    %c0_i32_1 = arith.constant 0 : i32
    return %c0_i32, %c0_i32_0 : i32, i32
  }
  func.func @transform_3(%arg0: i32) -> (i32, i32) {
    %c0_i32 = arith.constant 0 : i32
    %c0_i32_0 = arith.constant 0 : i32
    %c0_i32_1 = arith.constant 0 : i32
    return %c0_i32, %c0_i32_0 : i32, i32
  }
  func.func @transform_4(%arg0: i32) -> (i32, i32) {
    %c0_i32 = arith.constant 0 : i32
    %c0_i32_0 = arith.constant 0 : i32
    %c0_i32_1 = arith.constant 0 : i32
    return %c0_i32, %c0_i32_0 : i32, i32
  }
  func.func @transform_5(%arg0: i32) -> (i32, i32) {
    %c0_i32 = arith.constant 0 : i32
    %c0_i32_0 = arith.constant 0 : i32
    %c0_i32_1 = arith.constant 0 : i32
    return %c0_i32, %c0_i32_0 : i32, i32
  }
  func.func @transform_6(%arg0: i32) -> (i32, i32, i32) {
    %c0_i32 = arith.constant 0 : i32
    %c0_i32_0 = arith.constant 0 : i32
    %c0_i32_1 = arith.constant 0 : i32
    return %arg0, %c0_i32, %c0_i32_0 : i32, i32, i32
  }
}

</mosaic_0001>

<bundles_post_ra>
// kernel: tpu_custom_call.1
= control target key start
LH: loop header
LB: loop body
LE: loop exit
PB: predicated region body
PF: predicated region fallthrough
CT: control target
= control target key end

     0   :  { %11 = vsyncpa [#allocation3], 0  ;;  %s1906_s0 = inlined_call_operand.hbm [shape: bf16[2,16,128], index: 0, kind: input, shape index: {}]   ;;  %s1907_s1 = inlined_call_operand.hbm [shape: bf16[384,128], index: 1, kind: input, shape index: {}]   ;;  %s1908_s2 = inlined_call_operand.hbm [shape: bf16[384,128], index: 2, kind: input, shape index: {}]   ;;  %s1909_s3 = inlined_call_operand.hbm [shape: bf16[128,128], index: 3, kind: input, shape index: {}]   ;;  %s1910_s4 = inlined_call_operand.hbm [shape: f32[3,128], index: 4, kind: input, shape index: {}]   ;;  %s1911_s5 = inlined_call_operand.hbm [shape: f32[12,128], index: 5, kind: input, shape index: {}]   ;;  %s1912_s6 = inlined_call_operand.vmem [shape: bf16[2,12,128], index: 6, kind: output, shape index: {}]  }
   0x1   :  { %13 = vsyncpa [#allocation3 + $0x1], 0 }
   0x2   :  { %14 = vsyncpa [#allocation5], 0 }
   0x3   :  { %15 = vsyncpa [#allocation8], 0 }
   0x4   :  { %16 = vsyncpa [#allocation11], 0  ;;  %s1744_s21 = smov 0   ;;  %s1746_s22 = smov 0  }
   0x5   :  { %s1748_s23 = smov 0   ;;  %s1750_s24 = smov 0  }
   0x6 LB: > { %s195_s27 = sshll.u32 %s1907_s1, 4  ;;  %s1768_s28 = sadd.s32 4294967295, %s1698_s24   ;;  %s1698_s24 = sphi %s1750_s24, %s1920_s24   ;;  %s1694_s23 = sphi %s1748_s23, %s1919_s23   ;;  %s1690_s22 = sphi %s1746_s22, %s1918_s22   ;;  %s1686_s21 = sphi %s1744_s21, %s1917_s21   ;;  %s196_s27 = int_to_ptr.hbm [resolvable:$true] %s195_s27 }
   0x7   : > { %p1070_p0 = scmp.ge.s32.totalorder %s1698_s24, 1  ;;  %p43_p1 = scmp.eq.s32.totalorder %s1768_s28, 0 }
   0x8   : > { %p184_p2 = scmp.lt.s32.totalorder %s1698_s24, 3  ;;  %s1700_s30 = smov [#allocation4]  }
   0x9   : > { %s197_s7 = sshll.u32 %s1700_s30, 4  ;;  %s223_s10 = sshll.u32 %s1909_s3, 4  ;;  %s198_s7 = int_to_ptr.vmem [resolvable:$true] %s197_s7  ;;  %s224_s10 = int_to_ptr.hbm [resolvable:$true] %s223_s10 }
   0xa   : > { %p1773_p3 = pnand %p1070_p0, %p184_p2  ;;  %s209_s14 = sshll.u32 %s1908_s2, 4  ;;  %s210_s14 = int_to_ptr.hbm [resolvable:$true] %s209_s14 }
   0xb   : > { %s1701_s15 = smov [#allocation7]   ;;  %s1702_s17 = smov 64  }
   0xc   : > { %p1400_p4 = pneg %p1773_p3  ;;  %s225_s16 = sshll.u32 %s1701_s15, 4  ;;  %s226_s16 = int_to_ptr.vmem [resolvable:$true] %s225_s16 }
   0xd   : > { %s1703_s18 = smov 4   ;;  %s238_s25 = sshll.u32 %s1910_s4, 4  ;;  %s239_s25 = int_to_ptr.hbm [resolvable:$true] %s238_s25 }
   0xe   : > { %p1784_p5 = pnand %p1400_p4, %p43_p1  ;;  %s1704_s26 = smov [#allocation6]  }
   0xf   : > { %s211_s30 = sshll.u32 %s1704_s26, 4  ;;  %s1706_s12 = smov [#allocation10]   ;;  %s212_s30 = int_to_ptr.vmem [resolvable:$true] %s211_s30 }
  0x10   : > { %1403 = dma.hbm_to_vmem [thread:$0]  (!%p1784_p5), %s196_s27, 3072, %s198_s7, [#allocation5], %s1702_s17, %s1702_s17, %s1703_s18  }
  0x11   : > { %1409 = dma.hbm_to_vmem [thread:$0]  (!%p1784_p5), %s224_s10, 1024, %s226_s16, [#allocation8], %s1702_s17, %s1702_s17, %s1703_s18  }
  0x12   : > { %1406 = dma.hbm_to_vmem [thread:$0]  (!%p1784_p5), %s210_s14, 3072, %s212_s30, [#allocation5], %s1702_s17, %s1702_s17, %s1703_s18  }
  0x13   : > { %s1705_s27 = smov [#allocation9]   ;;  %s249_s10 = sshll.u32 %s1911_s5, 4  ;;  %s250_s10 = int_to_ptr.hbm [resolvable:$true] %s249_s10 }
  0x14   : > { %s240_s7 = sshll.u32 %s1705_s27, 4  ;;  %s251_s13 = sshll.u32 %s1706_s12, 4  ;;  %s241_s7 = int_to_ptr.vmem [resolvable:$true] %s240_s7  ;;  %s252_s13 = int_to_ptr.vmem [resolvable:$true] %s251_s13 }
  0x15   : > { %1412 = dma.hbm_to_vmem [thread:$0]  (!%p1784_p5), %s239_s25, 64, %s241_s7, [#allocation8]  }
  0x16   : > { %s1707_s14 = smov 128   ;;  %s1708_s15 = smov 8  }
  0x17   : > { %1415 = dma.hbm_to_vmem [thread:$0]  (!%p1784_p5), %s250_s10, 256, %s252_s13, [#allocation11], %s1707_s14, %s1707_s14, %s1708_s15  }
  0x18   : > { %s1817_s16 = sadd.s32 1, %s1698_s24   ;;  %s29_s20 = sadd.s32 1, %s1694_s23 }
  0x19   : > { %s26_s19 = ssub.s32 %s1698_s24, %s1817_s16  ;;  %p36_p7 = scmp.ne.s32.totalorder %s1694_s23, %s1690_s22 }
  0x1a   : > { %p27_p6 = scmp.eq.s32.totalorder %s26_s19, 0  ;;  %p37_p8 = scmp.eq.s32.totalorder %s1698_s24, 0 }
  0x1b   : > { %p42_p9 = scmp.ne.s32.totalorder %s1690_s22, %s1686_s21  ;;  %p1425_p12 = scmp.lt.s32.totalorder %s1698_s24, 2 }
  0x1c   : > { %s1828_s25 = scalar_select %p27_p6, %s1694_s23, %s29_s20  }
  0x1d   : > { %p38_p10 = por %p37_p8, %p36_p7  ;;  %p1832_p11 = por %p43_p1, %p42_p9 }
  0x1e   : > { %s265_s11 = sand.u32 1, %s1694_s23   ;;  %s1319_s27 = sshll.u32 %s1698_s24, 3 }
  0x1f   : > { %s1077_s30 = sshll.u32 %s265_s11, 3  ;;  %s274_s9 = scalar_lea.hbm %s1906_s0, %s1319_s27 }
  0x20   : > { %s269_s10 = scalar_lea.vmem [#allocation2], %s1077_s30  ;;  %s275_s13 = sshll.u32 %s274_s9, 4  ;;  %s276_s13 = int_to_ptr.hbm [resolvable:$true] %s275_s13 }
  0x21   : > { %s277_s12 = sshll.u32 %s269_s10, 4  ;;  %p1842_p13 = pnand %p1425_p12, %p38_p10  ;;  %s278_s12 = int_to_ptr.vmem [resolvable:$true] %s277_s12 }
  0x22   : > { %s266_s14 = scalar_lea.sflag [#allocation3], %s265_s11  ;;  %s1622_s15 = sshra.s32 %s276_s13, 4  ;;  %s1623_s15 = int_to_ptr.hbm [resolvable:$true] %s1622_s15 }
  0x23   : > { %s1624_s19 = scalar_lea.hbm %s1623_s15, 8  ;;  %p1626_p2 = pneg %p1842_p13 }
  0x24   : > { %p1625_p0 = scmp.ne.s32.totalorder %s1623_s15, %s1624_s19  ;;  %s1629_s30 = scalar_lea.hbm %s1906_s0, 16 }
  0x25   : > { %p1630_p6 = scmp.lt.s32.totalorder %s1623_s15, %s1906_s0  ;;  %p1631_p7 = scmp.lt.s32.totalorder %s1629_s30, %s1624_s19 }
  0x26   : > { %p1627_p4 = pnand %p1626_p2, %p1625_p0 }
  0x27   : > { %p1632_p8 = por %p1631_p7, %p1630_p6 }
  0x28   : > { %p1628_p5 = pneg %p1627_p4 }
  0x2a   : > { %p1633_p9 = pnand %p1632_p8, %p1628_p5 }
  0x2c   : > { %1636 = shalt.err (!%p1633_p9)
}
  0x2d   : > { %1419 = dma.hbm_to_vmem [thread:$0]  (!%p1842_p13), %s276_s13, 128, %s278_s12, %s266_s14, %s1702_s17, %s1702_s17, %s1703_s18  }
  0x2e   : > { %289 = sbr.rel (%p1773_p3) target bundleno = 539 (0x21b), region = 44  ;;  %s291_s11 = sand.u32 (!%p1773_p3), 1, %s1690_s22  }
  0x2f   : > { %s1862_s8 = sshll.u32 (!%p1773_p3), %s291_s11, 3  ;;  %s292_s9 = scalar_lea.sflag (!%p1773_p3), [#allocation3], %s291_s11 }
  0x30   : > { %s295_s10 = scalar_lea.vmem (!%p1773_p3), [#allocation2], %s1862_s8 }
  0x33   : > { %1669 = dma.done.wait (%p1832_p11), %s292_s9, 128  }
  0x34   : > { %1671 = vsyncadd (%p1832_p11), %s292_s9, 4294967168 }
  0x35   : > { %1673 = dma.done.wait (%p43_p1), [#allocation5], 6144  }
  0x36   : > { %1675 = vsyncadd (%p43_p1), [#allocation5], 4294961152 }
  0x37   : > { %1677 = dma.done.wait (%p43_p1), [#allocation8], 1088  }
  0x38   : > { %1679 = vsyncadd (%p43_p1), [#allocation8], 4294966208 }
  0x39   : > { %1681 = dma.done.wait (%p43_p1), [#allocation11], 256  }
  0x3a   : > { %1683 = vsyncadd (%p43_p1), [#allocation11], 4294967040  ;;  %v1328_v0 = vld [vmem:[#allocation4 + $0x38] sm:$0xff]  ;;  %v1327_v3 = vld [vmem:[#allocation4 + $0x30] sm:$0xff]  ;;  %p350_p1 = scmp.lt.s32.totalorder %s1768_s28, 1 }
  0x3b   : > { %v1336_v1 = vld [vmem:[#allocation4 + $0x78] sm:$0xff]  ;;  %633 = vmatpush.bf16.msra.mxu0 %v1328_v0  ;;  %v1335_v4 = vld [vmem:[#allocation4 + $0x70] sm:$0xff]  ;;  %v1326_v6 = vld [vmem:[#allocation4 + $0x28] sm:$0xff] }
  0x3c   : > { %v1344_v2 = vld [vmem:[#allocation4 + $0xb8] sm:$0xff]  ;;  %647 = vmatpush.bf16.msra.mxu1 %v1336_v1  ;;  %v1343_v5 = vld [vmem:[#allocation4 + $0xb0] sm:$0xff]  ;;  %v1334_v7 = vld [vmem:[#allocation4 + $0x68] sm:$0xff]  ;;  %s1922_s28 = smov (!%p350_p1, %s1768_s28), 1 }
  0x3d   : > { %661 = vmatpush.bf16.msra.mxu2 %v1344_v2  ;;  %v1342_v8 = vld [vmem:[#allocation4 + $0xa8] sm:$0xff]  ;;  %v1352_v9 = vld [vmem:[#allocation6 + $0x38] sm:$0xff]  ;;  %v1325_v10 = vld [vmem:[#allocation4 + $0x20] sm:$0xff]  ;;  %s1320_s29 = sshll.u32 %s1922_s28, 3 }
  0x3e   : > { %v1333_v11 = vld [vmem:[#allocation4 + $0x60] sm:$0xff]  ;;  %840 = vmatpush.bf16.msra.mxu3 %v1352_v9  ;;  %v1351_v13 = vld [vmem:[#allocation6 + $0x30] sm:$0xff]  ;;  %v1324_v14 = vld [vmem:[#allocation4 + $0x18] sm:$0xff]  ;;  %s354_s26 = scalar_lea.vmem %s1912_s6, %s1320_s29 }
  0x3f   : > { %634 = vmatpush.bf16.msra.mxu0 %v1327_v3  ;;  %v1341_v12 = vld [vmem:[#allocation4 + $0xa0] sm:$0xff]  ;;  %v1332_v15 = vld [vmem:[#allocation4 + $0x58] sm:$0xff]  ;;  %v1323_v18 = vld [vmem:[#allocation4 + $0x10] sm:$0xff] }
  0x40   : > { %648 = vmatpush.bf16.msra.mxu1 %v1335_v4  ;;  %v1340_v16 = vld [vmem:[#allocation4 + $0x98] sm:$0xff]  ;;  %v1331_v19 = vld [vmem:[#allocation4 + $0x50] sm:$0xff]  ;;  %v1322_v22 = vld [vmem:[#allocation4 + $0x8] sm:$0xff] }
  0x41   : > { %662 = vmatpush.bf16.msra.mxu2 %v1343_v5  ;;  %v1377_v17 = vld [vmem:[%s295_s10] sm:$0xff]  ;;  %v1330_v23 = vld [vmem:[#allocation4 + $0x48] sm:$0xff]  ;;  %v1321_v27 = vld [vmem:[#allocation4] sm:$0xff] }
  0x42   : > { %841 = vmatpush.bf16.msra.mxu3 %v1351_v13  ;;  %v1339_v20 = vld [vmem:[#allocation4 + $0x90] sm:$0xff]  ;;  %v481_v21 = vshll.u32 %v1377_v17, 16  ;;  %v1338_v24 = vld [vmem:[#allocation4 + $0x88] sm:$0xff]  ;;  %v479_v25 = vshrl.u32 %v1377_v17, 16  ;;  %v1329_v28 = vld [vmem:[#allocation4 + $0x40] sm:$0xff]  ;;  %v486_v32 = vrot.slane %v1377_v17, 1 }
  0x43   : > { %635 = vmatpush.bf16.msra.mxu0 %v1326_v6  ;;  %v1337_v29 = vld [vmem:[#allocation4 + $0x80] sm:$0xff]  ;;  %v1368_v30 = vld [vmem:[#allocation6 + $0xb8] sm:$0xff]  ;;  %v1367_v34 = vld [vmem:[#allocation6 + $0xb0] sm:$0xff] }
  0x44   : > { %649 = vmatpush.bf16.msra.mxu1 %v1334_v7  ;;  %v483_v26 = vrot.slane %v481_v21, 1  ;;  %v1360_v33 = vld [vmem:[#allocation6 + $0x78] sm:$0xff]  ;;  %v1350_v35 = vld [vmem:[#allocation6 + $0x28] sm:$0xff]  ;;  %v1359_v36 = vld [vmem:[#allocation6 + $0x70] sm:$0xff] }
  0x45   : > { %663 = vmatpush.bf16.msra.mxu2 %v1342_v8  ;;  %v1366_v37 = vld [vmem:[#allocation6 + $0xa8] sm:$0xff]  ;;  %v1349_v38 = vld [vmem:[#allocation6 + $0x20] sm:$0xff]  ;;  %v1348_v41 = vld [vmem:[#allocation6 + $0x18] sm:$0xff] }
  0x46   : > { %v484_v31 = vor.u32 %v483_v26, %v479_v25  ;;  %842 = vmatpush.bf16.msra.mxu3 %v1350_v35  ;;  %v1358_v39 = vld [vmem:[#allocation6 + $0x68] sm:$0xff]  ;;  %v1365_v40 = vld [vmem:[#allocation6 + $0xa0] sm:$0xff]  ;;  %v1364_v43 = vld [vmem:[#allocation6 + $0x98] sm:$0xff] }
  0x47   : > { %636 = vmatpush.bf16.msra.mxu0 %v1325_v10  ;;  %v1357_v42 = vld [vmem:[#allocation6 + $0x60] sm:$0xff]  ;;  %v1347_v44 = vld [vmem:[#allocation6 + $0x10] sm:$0xff]  ;;  %v1356_v45 = vld [vmem:[#allocation6 + $0x58] sm:$0xff] }
  0x48   : > { %650 = vmatpush.bf16.msra.mxu1 %v1333_v11  ;;  %v1363_v46 = vld [vmem:[#allocation6 + $0x90] sm:$0xff]  ;;  %v1346_v47 = vld [vmem:[#allocation6 + $0x8] sm:$0xff]  ;;  %v1345_v50 = vld [vmem:[#allocation6] sm:$0xff] }
  0x49   : > { %664 = vmatpush.bf16.msra.mxu2 %v1341_v12  ;;  %v1355_v48 = vld [vmem:[#allocation6 + $0x50] sm:$0xff]  ;;  %v1362_v49 = vld [vmem:[#allocation6 + $0x88] sm:$0xff]  ;;  %v1361_v52 = vld [vmem:[#allocation6 + $0x80] sm:$0xff] }
  0x4a   : > { %843 = vmatpush.bf16.msra.mxu3 %v1349_v38  ;;  %v1354_v51 = vld [vmem:[#allocation6 + $0x48] sm:$0xff]  ;;  %v1883_v53 = vld [vmem:[#allocation9] sm:$0x7]  ;;  %v1376_v57 = vld [vmem:[#allocation7 + $0x38] sm:$0xff] }
  0x4b   : > { %637 = vmatpush.bf16.msra.mxu0 %v1324_v14  ;;  %v1353_v54 = vld [vmem:[#allocation6 + $0x40] sm:$0xff]  ;;  %v488_v55 = vperm.slane %v1883_v53, 0  ;;  %v1375_v59 = vld [vmem:[#allocation7 + $0x30] sm:$0xff] }
  0x4c   : > { %651 = vmatpush.bf16.msra.mxu1 %v1332_v15  ;;  %v1371_v21 = vld [vmem:[#allocation7 + $0x10] sm:$0xff] }
  0x4d   : > { %665 = vmatpush.bf16.msra.mxu2 %v1340_v16 }
  0x4e   : > { %844 = vmatpush.bf16.msra.mxu3 %v1348_v41  ;;  %v468_v41 = vld [vmem:[#allocation10] sm:$0xff] }
  0x4f   : > { %638 = vmatpush.bf16.msra.mxu0 %v1323_v18  ;;  %v1374_v18 = vld [vmem:[#allocation7 + $0x28] sm:$0xff] }
  0x50   : > { %652 = vmatpush.bf16.msra.mxu1 %v1331_v19  ;;  %v1373_v19 = vld [vmem:[#allocation7 + $0x20] sm:$0xff] }
  0x51   : > { %666 = vmatpush.bf16.msra.mxu2 %v1339_v20  ;;  %v1372_v20 = vld [vmem:[#allocation7 + $0x18] sm:$0xff] }
  0x52   : > { %845 = vmatpush.bf16.msra.mxu3 %v1347_v44 }
  0x53   : > { %639 = vmatpush.bf16.msra.mxu0 %v1322_v22  ;;  %v1370_v22 = vld [vmem:[#allocation7 + $0x8] sm:$0xff] }
  0x54   : > { %653 = vmatpush.bf16.msra.mxu1 %v1330_v23  ;;  %v1369_v23 = vld [vmem:[#allocation7] sm:$0xff] }
  0x55   : > { %667 = vmatpush.bf16.msra.mxu2 %v1338_v24  ;;  %v695_v24 = vperm.slane %v1883_v53, 1 }
  0x56   : > { %846 = vmatpush.bf16.msra.mxu3 %v1346_v47 }
  0x57   : > { %640 = vmatpush.bf16.msra.mxu0 %v1321_v27 }
  0x58   : > { %654 = vmatpush.bf16.msra.mxu1 %v1329_v28 }
  0x59   : > { %668 = vmatpush.bf16.msra.mxu2 %v1337_v29 }
  0x5a   : > { %641 = vmatmul.bf16.vlgmr.msra.gmra.mxu0 %v1377_v17  ;;  %847 = vmatpush.bf16.msra.mxu3 %v1345_v50 }
  0x5b   : > { %655 = vmatmul.bf16.vlgmr.msra.gmra.mxu1 %v484_v31  ;;  %854 = vmatpush.bf16.msrb.mxu0 %v1360_v33 }
  0x5c   : > { %868 = vmatpush.bf16.msrb.mxu1 %v1368_v30  ;;  %669 = vmatmul.bf16.vlgmr.msra.gmra.mxu2 %v486_v32 }
  0x5d   : > { %934 = vmatpush.bf16.msrb.mxu2 %v1376_v57 }
  0x5f   : > { %855 = vmatpush.bf16.msrb.mxu0 %v1359_v36 }
  0x60   : > { %869 = vmatpush.bf16.msrb.mxu1 %v1367_v34 }
  0x61   : > { %935 = vmatpush.bf16.msrb.mxu2 %v1375_v59 }
  0x63   : > { %856 = vmatpush.bf16.msrb.mxu0 %v1358_v39 }
  0x64   : > { %870 = vmatpush.bf16.msrb.mxu1 %v1366_v37 }
  0x65   : > { %936 = vmatpush.bf16.msrb.mxu2 %v1374_v18 }
  0x67   : > { %857 = vmatpush.bf16.msrb.mxu0 %v1357_v42 }
  0x68   : > { %871 = vmatpush.bf16.msrb.mxu1 %v1365_v40  ;;  %v885_v40 = vperm.slane %v1883_v53, 2 }
  0x69   : > { %937 = vmatpush.bf16.msrb.mxu2 %v1373_v19 }
  0x6b   : > { %858 = vmatpush.bf16.msrb.mxu0 %v1356_v45 }
  0x6c   : > { %872 = vmatpush.bf16.msrb.mxu1 %v1364_v43 }
  0x6d   : > { %938 = vmatpush.bf16.msrb.mxu2 %v1372_v20 }
  0x6f   : > { %859 = vmatpush.bf16.msrb.mxu0 %v1355_v48 }
  0x70   : > { %873 = vmatpush.bf16.msrb.mxu1 %v1363_v46  ;;  %v469_v46 = vld [vmem:[#allocation10 + $0x8] sm:$0xf] }
  0x71   : > { %939 = vmatpush.bf16.msrb.mxu2 %v1371_v21 }
  0x73   : > { %860 = vmatpush.bf16.msrb.mxu0 %v1354_v51 }
  0x74   : > { %874 = vmatpush.bf16.msrb.mxu1 %v1362_v49 }
  0x75   : > { %940 = vmatpush.bf16.msrb.mxu2 %v1370_v22 }
  0x77   : > { %861 = vmatpush.bf16.msrb.mxu0 %v1353_v54 }
  0x78   : > { %875 = vmatpush.bf16.msrb.mxu1 %v1361_v52 }
  0x79   : > { %941 = vmatpush.bf16.msrb.mxu2 %v1369_v23 }
  0xd7   : > { %v642_v56 = vpop.f32.mrf.mxu0 }
  0xd8   : > { %v643_v58 = vadd.f32 %v642_v56, %v488_v55  ;;  %v656_v60 = vpop.f32.mrf.mxu1 }
  0xda   : > { %v657_v61 = vadd.f32 %v656_v60, %v643_v58 }
  0xdf   : > { %v670_v62 = vpop.f32.mrf.mxu2  ;;  %v644_v63 = vpop.f32.mrf.mxu0 }
  0xe0   : > { %v671_v0 = vadd.f32 %v670_v62, %v657_v61  ;;  %v645_v1 = vadd.f32 %v644_v63, %v488_v55  ;;  %v658_v2 = vpop.f32.mrf.mxu1 }
  0xe2   : > { %v675_v3 = vmax.f32 %v671_v0, 0.0  ;;  %v659_v4 = vadd.f32 %v658_v2, %v645_v1 }
  0xe4   : > { %v677_v7 = vpack.c.bf16 %v675_v3, %v675_v3 }
  0xe6   : > { %v681_v10 = vunpack.c.l.b16 %v677_v7 }
  0xe7   : > { %v672_v5 = vpop.f32.mrf.mxu2 }
  0xe8   : > { %v673_v6 = vadd.f32 %v672_v5, %v659_v4 }
  0xea   : > { %v676_v8 = vmax.f32 %v673_v6, 0.0 }
  0xec   : > { %v678_v9 = vpack.c.bf16 %v676_v8, %v676_v8 }
  0xee   : > { %v682_v11 = vunpack.c.l.b16 %v678_v9 }
  0xf0   : > { %v683_v12 = vpack.c.b16 %v682_v11, %v681_v10 }
  0xf2   : > { %848 = vmatmul.bf16.vlgmr.msra.gmra.mxu3 %v683_v12  ;;  %v693_v13 = vrot.slane %v683_v12, 1  ;;  %v688_v14 = vshll.u32 %v683_v12, 16  ;;  %v686_v15 = vshrl.u32 %v683_v12, 16 }
  0xf4   : > { %876 = vmatmul.bf16.vlgmr.msrb.gmra.mxu1 %v693_v13  ;;  %v690_v16 = vrot.slane %v688_v14, 1 }
  0xf6   : > { %v691_v17 = vor.u32 %v690_v16, %v686_v15 }
  0xf8   : > { %862 = vmatmul.bf16.vlgmr.msrb.gmra.mxu0 %v691_v17 }
 0x171   : > { %v877_v27 = vpop.f32.mrf.mxu1 }
 0x175   : > { %v849_v25 = vpop.f32.mrf.mxu3  ;;  %v863_v26 = vpop.f32.mrf.mxu0 }
 0x176   : > { %v850_v28 = vadd.f32 %v849_v25, %v695_v24 }
 0x178   : > { %v864_v29 = vadd.f32 %v863_v26, %v850_v28 }
 0x179   : > { %v879_v35 = vpop.f32.mrf.mxu1 }
 0x17a   : > { %v878_v33 = vadd.f32 %v877_v27, %v864_v29 }
 0x17c   : > { %v882_v37 = vmax.f32 %v878_v33, 0.0 }
 0x17d   : > { %v851_v30 = vpop.f32.mrf.mxu3  ;;  %v865_v32 = vpop.f32.mrf.mxu0 }
 0x17e   : > { %v852_v31 = vadd.f32 %v851_v30, %v695_v24 }
 0x180   : > { %v866_v34 = vadd.f32 %v865_v32, %v852_v31 }
 0x182   : > { %v880_v36 = vadd.f32 %v879_v35, %v866_v34 }
 0x184   : > { %v883_v38 = vmax.f32 %v880_v36, 0.0 }
 0x186   : > { %v884_v39 = vpack.c.bf16 %v883_v38, %v882_v37 }
 0x188   : > { %942 = vmatmul.bf16.vlgmr.msrb.gmra.mxu2 %v884_v39 }
 0x20b   : > { %v943_v42 = vpop.f32.mrf.mxu2 }
 0x20c   : > { %v944_v43 = vadd.f32 %v943_v42, %v885_v40 }
 0x20e   : > { %v948_v44 = vadd.f32 %v944_v43, %v468_v41 }
 0x210   : > { %v950_v45 = vpack.c.bf16 %v948_v44, %v948_v44 }
 0x212   : > { %952 = vst [vmem:[%s354_s26] sm:$0xf] %v950_v45 }
 0x213   : > { %v945_v47 = vpop.f32.mrf.mxu2 }
 0x214   : > { %v946_v48 = vadd.f32 %v945_v47, %v885_v40 }
 0x216   : > { %v949_v49 = vadd.f32 %v946_v48, %v469_v46 }
 0x218   : > { %v951_v50 = vpack.c.bf16 %v949_v49, %v949_v49 }
 0x21a   : > { %953 = vst [vmem:[%s354_s26 + $0x4] sm:$0x3] %v951_v50 }
 0x21b PF: > { %p19_p3 = scmp.ge.s32.totalorder %s1817_s16, 4   ;;  %s1917_s21 = smov %s1690_s22 }
 0x21c   : > { %s1918_s22 = smov %s1694_s23  ;;  %s1919_s23 = smov %s1828_s25 }
 0x21d   : > { %s1920_s24 = smov %s1817_s16  ;;  %21 = sbr.rel (!%p19_p3) target bundleno = 6 (0x6), region = 104 }
 0x222   :  { %975 = vsyncpa [#allocation3], 1 }
 0x223   :  { %977 = vsyncpa [#allocation3 + $0x1], 1 }
 0x224   :  { %978 = vsyncpa [#allocation5], 1 }
 0x225   :  { %979 = vsyncpa [#allocation8], 1 }
 0x226   :  { %980 = vsyncpa [#allocation11], 1 }

</bundles_post_ra>
